<compile_context>
chip_gen: v6e
topology: v6e:2x2x1
jax: 0.10.0
libtpu: 0.0.40
codegen_flags: <defaults>
</compile_context>

<pallas_src>
import functools

import jax
import jax.numpy as jnp
from jax.experimental import pallas as pl
from jax.experimental.pallas import tpu as pltpu

# Mirrors `world.useSigmoid` in the reference module (undefined there; we pick
# the sigmoid branch and keep the other available via this flag).
USE_SIGMOID = True

IN_F = 128
HID_F = 64
OUT_F = 2

# Per-buffer byte budget for the streamed x tile (pipeline double-buffers it):
# 2 MiB/buffer -> 4096 rows for f32, 8192 for bf16.
MAX_TILE_BYTES = 2 * 1024 * 1024
MIN_GRID_STEPS = 2  # >=2 steps: v7x megacore sharding + DMA/compute overlap.


def _mlp_kernel(x_ref, w1_ref, b1_ref, w2_ref, b2_ref, o_ref, *, use_sigmoid):
    # x_ref: (TILE_B, 128)  w1_ref: (128, 64)  b1_ref: (1, 64)
    # w2_ref: (64, 2)       b2_ref: (1, 2)     o_ref: (TILE_B, 2)
    # Feed the input dtype straight into the MXU; accumulate in f32.
    h = jnp.dot(x_ref[...], w1_ref[...], preferred_element_type=jnp.float32)
    h = jnp.maximum(h + b1_ref[...], 0.0)  # bias + ReLU on the VPU

    y = jnp.dot(h, w2_ref[...], preferred_element_type=jnp.float32) + b2_ref[...]
    if use_sigmoid:
        y = jax.nn.sigmoid(y)  # EUP (logistic) — tiny (TILE_B, 2) slab
    else:
        y = jnp.maximum(y, 0.0)

    o_ref[...] = y.astype(o_ref.dtype)


def _round_up(n, m):
    return ((n + m - 1) // m) * m


def _sublane(dtype):
    # Sub-32-bit dtypes pack along sublanes: 8 rows (4B), 16 (2B), 32 (1B).
    return max(8, 32 // jnp.dtype(dtype).itemsize)


def _choose_tile(batch, dtype):
    """Rows per grid step: sublane-aligned, VMEM-budgeted, >=2 steps if possible."""
    sub = _sublane(dtype)
    itemsize = jnp.dtype(dtype).itemsize
    max_rows = max(sub, (MAX_TILE_BYTES // (IN_F * itemsize)) // sub * sub)
    rounded = _round_up(batch, sub)
    if rounded <= MIN_GRID_STEPS * sub:
        # Too small to split into >=2 sublane-aligned steps: one tiny step.
        return min(rounded, max_rows)
    tile = _round_up(pl.cdiv(rounded, MIN_GRID_STEPS), sub)
    return max(sub, min(tile, max_rows))


def experiment_forward(x, w1, b1, w2, b2, *, use_sigmoid=USE_SIGMOID):
    """x: (B, 128) -> (B, 2) float32. Matches the PyTorch `experiment.forward`."""
    B, in_f = x.shape
    assert in_f == IN_F

    tile_b = _choose_tile(B, x.dtype)
    grid = (pl.cdiv(B, tile_b),)  # partial last block handled by Pallas; no pad copy

    # Biases as 2-D rows so they live cleanly in VMEM and broadcast over rows.
    b1_2d = b1.reshape(1, HID_F).astype(jnp.float32)
    b2_2d = b2.reshape(1, OUT_F).astype(jnp.float32)

    kernel = functools.partial(_mlp_kernel, use_sigmoid=use_sigmoid)

    weight_bytes = (w1.size * w1.dtype.itemsize + w2.size * w2.dtype.itemsize
                    + b1_2d.size * 4 + b2_2d.size * 4)
    cost = pl.CostEstimate(
        flops=2 * B * (IN_F * HID_F + HID_F * OUT_F),
        transcendentals=(B * OUT_F) if use_sigmoid else 0,
        bytes_accessed=(B * IN_F * x.dtype.itemsize
                        + B * OUT_F * 4
                        + weight_bytes),
    )

    return pl.pallas_call(
        kernel,
        out_shape=jax.ShapeDtypeStruct((B, OUT_F), jnp.float32),
        grid=grid,
        in_specs=[
            pl.BlockSpec((tile_b, IN_F), lambda i: (i, 0)),   # x tile (streamed)
            pl.BlockSpec((IN_F, HID_F), lambda i: (0, 0)),    # W1 (resident)
            pl.BlockSpec((1, HID_F), lambda i: (0, 0)),       # b1 (resident)
            pl.BlockSpec((HID_F, OUT_F), lambda i: (0, 0)),   # W2 (resident)
            pl.BlockSpec((1, OUT_F), lambda i: (0, 0)),       # b2 (resident)
        ],
        out_specs=pl.BlockSpec((tile_b, OUT_F), lambda i: (i, 0)),
        compiler_params=pltpu.CompilerParams(
            dimension_semantics=("parallel",),
        ),
        cost_estimate=cost,
    )(x, w1, b1_2d, w2, b2_2d)


def _reference(x, w1, b1, w2, b2, *, use_sigmoid=USE_SIGMOID):
    h = jnp.maximum(x.astype(jnp.float32) @ w1.astype(jnp.float32) + b1, 0.0)
    y = h @ w2.astype(jnp.float32) + b2
    return jax.nn.sigmoid(y) if use_sigmoid else jnp.maximum(y, 0.0)


if __name__ == "__main__":
    key = jax.random.PRNGKey(0)
    kx, k1, kb1, k2, kb2 = jax.random.split(key, 5)

    # Small demo shapes consistent with the module's forward (B, 128) -> (B, 2).
    B = 8
    x = jax.random.normal(kx, (B, IN_F), dtype=jnp.float32)

    # Deterministic parameter init (Kaiming-uniform-ish bounds like nn.Linear).
    bound1 = 1.0 / (IN_F ** 0.5)
    w1 = jax.random.uniform(k1, (IN_F, HID_F), jnp.float32, -bound1, bound1)
    b1 = jax.random.uniform(kb1, (HID_F,), jnp.float32, -bound1, bound1)
    bound2 = 1.0 / (HID_F ** 0.5)
    w2 = jax.random.uniform(k2, (HID_F, OUT_F), jnp.float32, -bound2, bound2)
    b2 = jax.random.uniform(kb2, (OUT_F,), jnp.float32, -bound2, bound2)

    out = jax.block_until_ready(experiment_forward(x, w1, b1, w2, b2))
    ref = _reference(x, w1, b1, w2, b2)
    assert out.shape == (B, OUT_F)
    assert jnp.allclose(out, ref, atol=1e-5, rtol=1e-5), "mismatch vs JAX reference"

    # Ragged multi-tile batch: exercises the no-pad partial-last-block path
    # with 2 parallel grid steps (megacore-friendly on v7x).
    B2 = 2500
    x2 = jax.random.normal(kx, (B2, IN_F), dtype=jnp.float32)
    out2 = jax.block_until_ready(experiment_forward(x2, w1, b1, w2, b2))
    ref2 = _reference(x2, w1, b1, w2, b2)
    assert out2.shape == (B2, OUT_F)
    assert jnp.allclose(out2, ref2, atol=1e-5, rtol=1e-5), "mismatch on ragged batch"

    # bf16 input/weight path: halves the x HBM read; 16-row sublane packing.
    x3 = x2.astype(jnp.bfloat16)
    w1b = w1.astype(jnp.bfloat16)
    w2b = w2.astype(jnp.bfloat16)
    out3 = jax.block_until_ready(experiment_forward(x3, w1b, b1, w2b, b2))
    ref3 = _reference(x3, w1b, b1, w2b, b2)
    assert out3.shape == (B2, OUT_F)
    assert jnp.allclose(out3, ref3, atol=2e-3, rtol=1e-3), "mismatch on bf16 path"

    print("KERNEL_OK")
</pallas_src>

<mosaic_0001>
module attributes {stable_mosaic.version = 11 : i64} {
  func.func @_mlp_kernel(%arg0: i32, %arg1: memref<8x128xf32, #tpu.memory_space<vmem>>, %arg2: memref<128x64xf32, #tpu.memory_space<vmem>>, %arg3: memref<1x64xf32, #tpu.memory_space<vmem>>, %arg4: memref<64x2xf32, #tpu.memory_space<vmem>>, %arg5: memref<1x2xf32, #tpu.memory_space<vmem>>, %arg6: memref<8x2xf32, #tpu.memory_space<vmem>>) attributes {dimension_semantics = [#tpu.dimension_semantics<parallel>], iteration_bounds = array<i64: 1>, scalar_prefetch = 0 : i64, scratch_operands = 0 : i64, tpu.core_type = #tpu.core_type<tc>, window_params = [{transform_indices = @transform_0, window_bounds = array<i64: 8, 128>}, {pipeline_mode = #tpu.pipeline_mode<synchronous>, transform_indices = @transform_1, window_bounds = array<i64: 128, 64>}, {pipeline_mode = #tpu.pipeline_mode<synchronous>, transform_indices = @transform_2, window_bounds = array<i64: 1, 64>}, {pipeline_mode = #tpu.pipeline_mode<synchronous>, transform_indices = @transform_3, window_bounds = array<i64: 64, 2>}, {pipeline_mode = #tpu.pipeline_mode<synchronous>, transform_indices = @transform_4, window_bounds = array<i64: 1, 2>}, {transform_indices = @transform_5, window_bounds = array<i64: 8, 2>}]} {
    %c0 = arith.constant 0 : index
    %c0_0 = arith.constant 0 : index
    %0 = vector.load %arg1[%c0, %c0_0] : memref<8x128xf32, #tpu.memory_space<vmem>>, vector<8x128xf32>
    %c0_1 = arith.constant 0 : index
    %c0_2 = arith.constant 0 : index
    %1 = vector.load %arg2[%c0_1, %c0_2] : memref<128x64xf32, #tpu.memory_space<vmem>>, vector<128x64xf32>
    %cst = arith.constant dense<0.000000e+00> : vector<8x64xf32>
    %2 = tpu.matmul %0, %1, %cst {dimension_numbers = #tpu.dot_dimension_numbers<[1], [0], [0], [1], [0, 0, 1, 1], [], []>} : vector<8x128xf32>, vector<128x64xf32>, vector<8x64xf32> -> vector<8x64xf32>
    %c0_3 = arith.constant 0 : index
    %c0_4 = arith.constant 0 : index
    %3 = vector.load %arg3[%c0_3, %c0_4] : memref<1x64xf32, #tpu.memory_space<vmem>>, vector<1x64xf32>
    %4 = vector.broadcast %3 : vector<1x64xf32> to vector<8x64xf32>
    %5 = arith.addf %2, %4 : vector<8x64xf32>
    %cst_5 = arith.constant 0.000000e+00 : f32
    %6 = vector.broadcast %cst_5 : f32 to vector<8x64xf32>
    %7 = arith.maximumf %5, %6 : vector<8x64xf32>
    %c0_6 = arith.constant 0 : index
    %c0_7 = arith.constant 0 : index
    %8 = vector.load %arg4[%c0_6, %c0_7] : memref<64x2xf32, #tpu.memory_space<vmem>>, vector<64x2xf32>
    %cst_8 = arith.constant dense<0.000000e+00> : vector<8x2xf32>
    %9 = tpu.matmul %7, %8, %cst_8 {dimension_numbers = #tpu.dot_dimension_numbers<[1], [0], [0], [1], [0, 0, 1, 1], [], []>} : vector<8x64xf32>, vector<64x2xf32>, vector<8x2xf32> -> vector<8x2xf32>
    %c0_9 = arith.constant 0 : index
    %c0_10 = arith.constant 0 : index
    %10 = vector.load %arg5[%c0_9, %c0_10] : memref<1x2xf32, #tpu.memory_space<vmem>>, vector<1x2xf32>
    %11 = vector.broadcast %10 : vector<1x2xf32> to vector<8x2xf32>
    %12 = arith.addf %9, %11 : vector<8x2xf32>
    %13 = arith.negf %12 : vector<8x2xf32>
    %14 = math.exp %13 : vector<8x2xf32>
    %cst_11 = arith.constant 1.000000e+00 : f32
    %15 = vector.broadcast %cst_11 : f32 to vector<8x2xf32>
    %16 = arith.addf %15, %14 : vector<8x2xf32>
    %17 = arith.divf %15, %16 : vector<8x2xf32>
    %c0_12 = arith.constant 0 : index
    %c0_13 = arith.constant 0 : index
    %18 = vector.load %arg6[%c0_12, %c0_13] : memref<8x2xf32, #tpu.memory_space<vmem>>, vector<8x2xf32>
    tpu.vector_store %arg6[%c0_12, %c0_13], %17 {strides = array<i32>} : memref<8x2xf32, #tpu.memory_space<vmem>>, vector<8x2xf32>,
    return
  }
  func.func @transform_0(%arg0: i32) -> (i32, i32) {
    %c0_i32 = arith.constant 0 : i32
    %c0_i32_0 = arith.constant 0 : i32
    return %arg0, %c0_i32 : i32, i32
  }
  func.func @transform_1(%arg0: i32) -> (i32, i32) {
    %c0_i32 = arith.constant 0 : i32
    %c0_i32_0 = arith.constant 0 : i32
    %c0_i32_1 = arith.constant 0 : i32
    return %c0_i32, %c0_i32_0 : i32, i32
  }
  func.func @transform_2(%arg0: i32) -> (i32, i32) {
    %c0_i32 = arith.constant 0 : i32
    %c0_i32_0 = arith.constant 0 : i32
    %c0_i32_1 = arith.constant 0 : i32
    return %c0_i32, %c0_i32_0 : i32, i32
  }
  func.func @transform_3(%arg0: i32) -> (i32, i32) {
    %c0_i32 = arith.constant 0 : i32
    %c0_i32_0 = arith.constant 0 : i32
    %c0_i32_1 = arith.constant 0 : i32
    return %c0_i32, %c0_i32_0 : i32, i32
  }
  func.func @transform_4(%arg0: i32) -> (i32, i32) {
    %c0_i32 = arith.constant 0 : i32
    %c0_i32_0 = arith.constant 0 : i32
    %c0_i32_1 = arith.constant 0 : i32
    return %c0_i32, %c0_i32_0 : i32, i32
  }
  func.func @transform_5(%arg0: i32) -> (i32, i32) {
    %c0_i32 = arith.constant 0 : i32
    %c0_i32_0 = arith.constant 0 : i32
    return %arg0, %c0_i32 : i32, i32
  }
}

</mosaic_0001>

<bundles_post_ra>
// kernel: tpu_custom_call.1
= control target key start
LH: loop header
LB: loop body
LE: loop exit
PB: predicated region body
PF: predicated region fallthrough
CT: control target
= control target key end

     0   :  { %v306_v0 = vmov 0.0   ;;  %vm307_vm0 = vmmov 0   ;;  %vm130_vm1 = vcmask 523264   ;;  %vm210_vm2 = vcmask 15360   ;;  %s448_s1 = inlined_call_operand.vmem [shape: f32[128,64], index: 1, kind: input, shape index: {}]   ;;  %s449_s3 = inlined_call_operand.vmem [shape: f32[64,2], index: 3, kind: input, shape index: {}]   ;;  %s450_s0 = inlined_call_operand.vmem [shape: f32[8,128], index: 0, kind: input, shape index: {}]   ;;  %s451_s2 = inlined_call_operand.vmem [shape: f32[1,64], index: 2, kind: input, shape index: {}]   ;;  %s452_s4 = inlined_call_operand.vmem [shape: f32[1,2], index: 4, kind: input, shape index: {}]   ;;  %s453_s5 = inlined_call_operand.vmem [shape: f32[8,2], index: 5, kind: output, shape index: {}]  }
   0x1   :  { %246 = vmatprep.subr.mxu0 %v306_v0  ;;  %v36_v1 = vld [vmem:[%s448_s1 + $0x78] sm:$0xff]  ;;  %v35_v2 = vld [vmem:[%s448_s1 + $0x70] sm:$0xff]  ;;  %278 = vmatprep.mubr.msk.f32.mxu0 %vm307_vm0, %v306_v0  ;;  %v34_v3 = vld [vmem:[%s448_s1 + $0x68] sm:$0xff] }
   0x2   :  { %247 = vmatpush3.msra.mxu0 %v36_v1  ;;  %281 = vmatprep.subr.mxu1 %v306_v0  ;;  %v33_v4 = vld [vmem:[%s448_s1 + $0x60] sm:$0xff]  ;;  %v122_v5 = vld [vmem:[%s449_s3 + $0x38] sm:$0xff]  ;;  %v121_v7 = vld [vmem:[%s449_s3 + $0x30] sm:$0xff] }
   0x3   :  { %248 = vmatprep.subr.mxu0 %v306_v0  ;;  %297 = vmatprep.mubr.msk.f32.mxu1 %vm307_vm0, %v306_v0  ;;  %v32_v6 = vld [vmem:[%s448_s1 + $0x58] sm:$0xff]  ;;  %v120_v8 = vld [vmem:[%s449_s3 + $0x28] sm:$0xff]  ;;  %v31_v9 = vld [vmem:[%s448_s1 + $0x50] sm:$0xff] }
   0x4   :  { %249 = vmatpush3.msra.mxu0 %v35_v2  ;;  %282 = vmatpush3.msra.mxu1 %v122_v5  ;;  %v119_v10 = vld [vmem:[%s449_s3 + $0x20] sm:$0xff]  ;;  %v30_v11 = vld [vmem:[%s448_s1 + $0x48] sm:$0xff]  ;;  %v118_v12 = vld [vmem:[%s449_s3 + $0x18] sm:$0xff] }
   0x5   :  { %250 = vmatprep.subr.mxu0 %v306_v0  ;;  %283 = vmatprep.subr.mxu1 %v306_v0  ;;  %v29_v13 = vld [vmem:[%s448_s1 + $0x40] sm:$0xff]  ;;  %v28_v14 = vld [vmem:[%s448_s1 + $0x38] sm:$0xff]  ;;  %v27_v15 = vld [vmem:[%s448_s1 + $0x30] sm:$0xff] }
   0x6   :  { %251 = vmatpush3.msra.mxu0 %v34_v3  ;;  %284 = vmatpush3.msra.mxu1 %v121_v7  ;;  %v26_v16 = vld [vmem:[%s448_s1 + $0x28] sm:$0xff]  ;;  %v25_v17 = vld [vmem:[%s448_s1 + $0x20] sm:$0xff]  ;;  %v24_v18 = vld [vmem:[%s448_s1 + $0x18] sm:$0xff] }
   0x7   :  { %252 = vmatprep.subr.mxu0 %v306_v0  ;;  %285 = vmatprep.subr.mxu1 %v306_v0  ;;  %v23_v19 = vld [vmem:[%s448_s1 + $0x10] sm:$0xff]  ;;  %v22_v20 = vld [vmem:[%s448_s1 + $0x8] sm:$0xff]  ;;  %v21_v21 = vld [vmem:[%s448_s1] sm:$0xff] }
   0x8   :  { %253 = vmatpush3.msra.mxu0 %v33_v4  ;;  %286 = vmatpush3.msra.mxu1 %v120_v8  ;;  %v20_v22 = vld [vmem:[%s450_s0] sm:$0xff]  ;;  %v117_v23 = vld [vmem:[%s449_s3 + $0x10] sm:$0xff]  ;;  %v116_v24 = vld [vmem:[%s449_s3 + $0x8] sm:$0xff] }
   0x9   :  { %254 = vmatprep.subr.mxu0 %v306_v0  ;;  %287 = vmatprep.subr.mxu1 %v306_v0  ;;  %v115_v25 = vld [vmem:[%s449_s3] sm:$0xff] }
   0xa   :  { %255 = vmatpush3.msra.mxu0 %v32_v6  ;;  %288 = vmatpush3.msra.mxu1 %v119_v10  ;;  %v216_v26 = vld [vmem:[%s451_s2] ss:$0 sm:$0xff] }
   0xb   :  { %256 = vmatprep.subr.mxu0 %v306_v0  ;;  %289 = vmatprep.subr.mxu1 %v306_v0  ;;  %v217_v31 = vld [vmem:[%s452_s4] ss:$0 sm:$0xff] }
   0xc   :  { %257 = vmatpush3.msra.mxu0 %v31_v9  ;;  %290 = vmatpush3.msra.mxu1 %v118_v12 }
   0xd   :  { %258 = vmatprep.subr.mxu0 %v306_v0  ;;  %291 = vmatprep.subr.mxu1 %v306_v0 }
   0xe   :  { %259 = vmatpush3.msra.mxu0 %v30_v11  ;;  %292 = vmatpush3.msra.mxu1 %v117_v23 }
   0xf   :  { %260 = vmatprep.subr.mxu0 %v306_v0  ;;  %293 = vmatprep.subr.mxu1 %v306_v0 }
  0x10   :  { %261 = vmatpush3.msra.mxu0 %v29_v13  ;;  %294 = vmatpush3.msra.mxu1 %v116_v24 }
  0x11   :  { %262 = vmatprep.subr.mxu0 %v306_v0  ;;  %295 = vmatprep.subr.mxu1 %v306_v0 }
  0x12   :  { %263 = vmatpush3.msra.mxu0 %v28_v14  ;;  %296 = vmatpush3.msra.mxu1 %v115_v25 }
  0x13   :  { %264 = vmatprep.subr.mxu0 %v306_v0 }
  0x14   :  { %265 = vmatpush3.msra.mxu0 %v27_v15 }
  0x15   :  { %266 = vmatprep.subr.mxu0 %v306_v0 }
  0x16   :  { %267 = vmatpush3.msra.mxu0 %v26_v16 }
  0x17   :  { %268 = vmatprep.subr.mxu0 %v306_v0 }
  0x18   :  { %269 = vmatpush3.msra.mxu0 %v25_v17 }
  0x19   :  { %270 = vmatprep.subr.mxu0 %v306_v0 }
  0x1a   :  { %271 = vmatpush3.msra.mxu0 %v24_v18 }
  0x1b   :  { %272 = vmatprep.subr.mxu0 %v306_v0 }
  0x1c   :  { %273 = vmatpush3.msra.mxu0 %v23_v19 }
  0x1d   :  { %274 = vmatprep.subr.mxu0 %v306_v0 }
  0x1e   :  { %275 = vmatpush3.msra.mxu0 %v22_v20 }
  0x1f   :  { %276 = vmatprep.subr.mxu0 %v306_v0 }
  0x20   :  { %277 = vmatpush3.msra.mxu0 %v21_v21 }
  0x21   :  { %279 = vmatmul.mubr.f32.vlgmr.msra.gmra.mxu0 %v20_v22 }
  0xe1   :  { %v110_v27 = vpop.f32.mrf.mxu0 }
  0xe2   :  { %v111_v28 = vadd.f32 %v216_v26, %v110_v27 }
  0xe3   :  { %v280_v29 = vpop.f32.mrf.mxu0 }
  0xe4   :  { %v114_v30 = vmax.f32 %v111_v28, 0.0 }
  0xe6   :  { %298 = vmatmul.mubr.msk.f32.vlgmr.msra.gmra.mxu1 %vm130_vm1, %v114_v30 }
 0x1a6   :  { %v200_v32 = vpop.f32.mrf.mxu1 }
 0x1a7   :  { %v201_v33 = vadd.f32 %v217_v31, %v200_v32 }
 0x1a8   :  { %v299_v34 = vpop.f32.mrf.mxu1 }
 0x1a9   :  { %v219_v35 = vmul.f32 -1.442695, %v201_v33 }
 0x1ab   :  { %302 = vpow2.f32 %v219_v35 }
 0x1b8   :  { %v303_v36 = vpop.eup %302 }
 0x1b9   :  { %v207_v37 = vadd.f32 1.0, %v303_v36 }
 0x1bb   :  { %304 = vrcp.f32 %v207_v37 }
 0x1c8   :  { %v305_v38 = vpop.eup %304 }
 0x1c9   :  { %211 = vst.msk [vmem:[%s453_s5] sm:$0xff] %vm210_vm2, %v305_v38 }

</bundles_post_ra>
